<compile_context>
chip_gen: v7x
topology: tpu7x:2x2x1
jax: 0.10.0
libtpu: 0.0.40
codegen_flags: <defaults>
</compile_context>

<pallas_src>
import functools
import math

import numpy as np
import jax
import jax.numpy as jnp
from jax.experimental import pallas as pl
from jax.experimental.pallas import tpu as pltpu

CONSTANT = 1e-5


def _round_up(x, m):
    return ((x + m - 1) // m) * m


# ----------------------------------------------------------------------------
# Deterministic parameter construction (librosa.filters.mel, slaney / norm=slaney)
# ----------------------------------------------------------------------------
def _hz_to_mel(freqs):
    freqs = np.asarray(freqs, dtype=np.float64)
    f_sp = 200.0 / 3
    mels = freqs / f_sp
    min_log_hz = 1000.0
    min_log_mel = min_log_hz / f_sp
    logstep = np.log(6.4) / 27.0
    return np.where(
        freqs >= min_log_hz,
        min_log_mel + np.log(np.maximum(freqs, 1e-10) / min_log_hz) / logstep,
        mels,
    )


def _mel_to_hz(mels):
    mels = np.asarray(mels, dtype=np.float64)
    f_sp = 200.0 / 3
    freqs = f_sp * mels
    min_log_hz = 1000.0
    min_log_mel = min_log_hz / f_sp
    logstep = np.log(6.4) / 27.0
    return np.where(
        mels >= min_log_mel,
        min_log_hz * np.exp(logstep * (mels - min_log_mel)),
        freqs,
    )


def mel_filterbank(sr, n_fft, n_mels, fmin, fmax):
    n_freqs = n_fft // 2 + 1
    fftfreqs = np.linspace(0.0, sr / 2.0, n_freqs)
    mel_pts = np.linspace(_hz_to_mel(fmin), _hz_to_mel(fmax), n_mels + 2)
    mel_f = _mel_to_hz(mel_pts)
    fdiff = np.diff(mel_f)
    ramps = mel_f[:, None] - fftfreqs[None, :]
    weights = np.zeros((n_mels, n_freqs), dtype=np.float64)
    for i in range(n_mels):
        lower = -ramps[i] / fdiff[i]
        upper = ramps[i + 2] / fdiff[i + 1]
        weights[i] = np.maximum(0.0, np.minimum(lower, upper))
    enorm = 2.0 / (mel_f[2: n_mels + 2] - mel_f[:n_mels])
    weights *= enorm[:, None]
    return weights.astype(np.float32)


# ----------------------------------------------------------------------------
# Pallas kernel 1: windowed DFT -> power -> mel -> log (+ per-tile masked stats)
# ----------------------------------------------------------------------------
def _stft_mel_log_kernel(seq_ref, frames_ref, dft_ref, fbt_ref, out_ref, stats_ref,
                         *, log_guard, nf_pad, nfilt, tt):
    # frames_ref: (1, tt, win) bf16         dft_ref: (win, 2*nf_pad) bf16 (cos|sin)
    # fbt_ref:    (nf_pad, nfilt_pad) bf16  out_ref: (1, nfilt, tt) f32  channel-major
    # stats_ref:  (1, 1, 2, nfilt_pad) f32  [masked sum ; masked sumsq] for this tile
    b = pl.program_id(0)
    t = pl.program_id(1)

    fr = frames_ref[0]                                               # (tt, win)
    # Fused windowed DFT: one MXU matmul producing [re | im], f32 accumulation.
    spec = jnp.dot(fr, dft_ref[...], preferred_element_type=jnp.float32)
    re = spec[:, :nf_pad]
    im = spec[:, nf_pad:]
    power = re * re + im * im                    # mag_power == 2.0, sum over (re, im)
    mel = jnp.dot(power.astype(jnp.bfloat16), fbt_ref[...],
                  preferred_element_type=jnp.float32)                # (tt, nfilt_pad)
    logmel = jnp.log(mel + log_guard)            # log_zero_guard_type == 'add'

    # Per-tile transpose under the MXU shadow; store channel-major, real filters only.
    out_ref[0] = logmel.T[:nfilt, :]                                 # (nfilt, tt)

    # Masked partial statistics for per-feature normalization (hidden under MXU).
    n = seq_ref[b]
    fidx = t * tt + jax.lax.broadcasted_iota(jnp.int32, (tt, 1), 0)
    masked = jnp.where(fidx < n, logmel, 0.0)
    s1 = jnp.sum(masked, axis=0, keepdims=True)                      # (1, nfilt_pad)
    s2 = jnp.sum(masked * masked, axis=0, keepdims=True)             # (1, nfilt_pad)
    stats_ref[0, 0] = jnp.concatenate([s1, s2], axis=0)              # (2, nfilt_pad)


# ----------------------------------------------------------------------------
# Pallas kernel 2: time-tiled apply of (x - mean) * inv_std + pad-mask
# ----------------------------------------------------------------------------
def _apply_norm_kernel(seq_ref, x_ref, ms_ref, o_ref, *, pad_value, tt):
    # x_ref: (1, nfilt, tt) f32 channel-major; ms_ref: (1, nfilt, 2) [mean | 1/std]
    b = pl.program_id(0)
    t = pl.program_id(1)
    n = seq_ref[b]
    x = x_ref[0]                                                     # (nfilt, tt)
    mean = ms_ref[0, :, 0:1]                                         # (nfilt, 1)
    istd = ms_ref[0, :, 1:2]                                         # (nfilt, 1)
    tidx = t * tt + jax.lax.broadcasted_iota(jnp.int32, x.shape, 1)
    o_ref[0] = jnp.where(tidx < n, (x - mean) * istd, pad_value)


# ----------------------------------------------------------------------------
# Featurizer wrapper
# ----------------------------------------------------------------------------
class FilterbankFeaturesPallas:
    def __init__(self, sample_rate=16000, n_window_size=320, n_window_stride=160,
                 window='hann', normalize='per_feature', n_fft=None, preemph=0.97,
                 nfilt=64, lowfreq=0, highfreq=None, log=True,
                 log_zero_guard_value=2 ** (-24), dither=CONSTANT, pad_to=16,
                 pad_value=0.0, mag_power=2.0, time_tile=512):
        assert normalize == 'per_feature' and log and mag_power == 2.0 and window == 'hann'
        assert time_tile % 128 == 0
        self.win_length = n_window_size
        self.hop_length = n_window_stride
        self.n_fft = n_fft or 2 ** math.ceil(math.log2(self.win_length))
        self.nfilt = nfilt
        self.preemph = preemph
        self.dither = dither
        self.pad_to = pad_to
        self.pad_value = pad_value
        self.log_zero_guard_value = log_zero_guard_value
        self.time_tile = time_tile                 # frames per kernel time tile

        self.n_freqs = self.n_fft // 2 + 1
        self.nf_pad = _round_up(self.n_freqs, 128)        # 257 -> 384 (lane aligned)
        self.nfilt_pad = _round_up(nfilt, 128)            # 64  -> 128 (MXU lane-dense)

        # torch.hann_window(win, periodic=False) == np.hanning(win); torch.stft
        # centers the win_length window inside n_fft, so only rows
        # [off, off+win) of the length-n_fft frame contribute -> strip them.
        self.frame_off = (self.n_fft - self.win_length) // 2          # 96 for 512/320
        win = np.hanning(self.win_length).astype(np.float64)

        n = (np.arange(self.win_length, dtype=np.float64) + self.frame_off)[:, None]
        f = np.arange(self.n_freqs, dtype=np.float64)[None, :]
        ang = 2.0 * np.pi * n * f / self.n_fft
        cos_m = (win[:, None] * np.cos(ang)).astype(np.float32)
        sin_m = (-win[:, None] * np.sin(ang)).astype(np.float32)
        dft = np.zeros((self.win_length, 2 * self.nf_pad), np.float32)  # [cos | sin]
        dft[:, :self.n_freqs] = cos_m
        dft[:, self.nf_pad:self.nf_pad + self.n_freqs] = sin_m
        self.dft_mat = jnp.asarray(dft).astype(jnp.bfloat16)          # (win, 2*nf_pad)

        fb = mel_filterbank(sample_rate, self.n_fft, nfilt, lowfreq,
                            highfreq or sample_rate / 2.0)            # (nfilt, n_freqs)
        fbt = np.zeros((self.nf_pad, self.nfilt_pad), np.float32)
        fbt[:self.n_freqs, :nfilt] = fb.T
        self.fb_t_pad = jnp.asarray(fbt).astype(jnp.bfloat16)         # (nf_pad, nfilt_pad)

    def __call__(self, x, seq_len, key):
        B, L = x.shape
        hop = self.hop_length
        win = self.win_length
        off = self.frame_off
        nfilt = self.nfilt

        # get_seq_len: ceil(samples / hop)
        seq_frames = jnp.ceil(seq_len.astype(jnp.float32) / hop).astype(jnp.int32)

        # dither (deterministic PRNG key instead of torch.randn_like)
        if self.dither > 0:
            x = x + self.dither * jax.random.normal(key, x.shape, dtype=x.dtype)

        # pre-emphasis
        if self.preemph is not None:
            x = jnp.concatenate([x[:, :1], x[:, 1:] - self.preemph * x[:, :-1]], axis=1)

        # torch.stft(center=True) framing: reflect-pad by n_fft//2; only the win-wide
        # region under the (centered, zero-padded) window is kept per frame.
        pad = self.n_fft // 2
        x_pad = jnp.pad(x, ((0, 0), (pad, pad)), mode='reflect')
        T = 1 + L // hop
        T_out = _round_up(T, 16)                  # eval-mode pad_to = 16

        # Time tiling: single full tile for short inputs, else lane-aligned tiles.
        if T_out <= self.time_tile:
            tt = T_out
        else:
            tt = self.time_tile                    # multiple of 128
        T_pad = _round_up(T_out, tt)
        n_tiles = T_pad // tt

        needed = off + (T_pad - 1) * hop + win
        if needed > x_pad.shape[1]:
            x_pad = jnp.pad(x_pad, ((0, 0), (0, needed - x_pad.shape[1])))
        if win == 2 * hop:
            # frame t = [chunk_t | chunk_{t+1}] -> cheap reshape + concat, fused with
            # the bf16 cast (no width-n_fft f32 gather + extra bf16 copy).
            chunks = x_pad[:, off:needed].reshape(B, T_pad + 1, hop)
            frames = jnp.concatenate([chunks[:, :-1], chunks[:, 1:]], axis=2)
        else:
            idx = (np.arange(T_pad) * hop)[:, None] + off + np.arange(win)[None, :]
            frames = x_pad[:, idx]
        frames = frames.astype(jnp.bfloat16)       # (B, T_pad, win) bf16

        # ---- Pallas kernel 1: windowed DFT -> power -> mel -> log (+ partial stats)
        kern1 = functools.partial(_stft_mel_log_kernel,
                                  log_guard=float(self.log_zero_guard_value),
                                  nf_pad=self.nf_pad, nfilt=nfilt, tt=tt)
        logmel_cm, stats = pl.pallas_call(
            kern1,
            out_shape=(
                jax.ShapeDtypeStruct((B, nfilt, T_pad), jnp.float32),
                jax.ShapeDtypeStruct((B, n_tiles, 2, self.nfilt_pad), jnp.float32),
            ),
            grid_spec=pltpu.PrefetchScalarGridSpec(
                num_scalar_prefetch=1,
                grid=(B, n_tiles),
                in_specs=[
                    pl.BlockSpec((1, tt, win), lambda b, t, seq: (b, t, 0)),
                    pl.BlockSpec((win, 2 * self.nf_pad), lambda b, t, seq: (0, 0)),
                    pl.BlockSpec((self.nf_pad, self.nfilt_pad), lambda b, t, seq: (0, 0)),
                ],
                out_specs=[
                    pl.BlockSpec((1, nfilt, tt), lambda b, t, seq: (b, 0, t)),
                    pl.BlockSpec((1, 1, 2, self.nfilt_pad), lambda b, t, seq: (b, t, 0, 0)),
                ],
            ),
            compiler_params=pltpu.CompilerParams(
                dimension_semantics=("parallel", "parallel")),
        )(seq_frames, frames, self.dft_mat, self.fb_t_pad)

        # ---- tiny XLA combine: per-feature mean and 1/std from tile partials ----
        sums = stats.sum(axis=1)                                     # (B, 2, nfilt_pad)
        nf = seq_frames.astype(jnp.float32)[:, None]                 # (B, 1)
        mean = sums[:, 0, :nfilt] / nf                               # (B, nfilt)
        var = (sums[:, 1, :nfilt] - nf * mean * mean) / (nf - 1.0)   # unbiased (torch)
        var = jnp.maximum(var, 0.0)
        istd = 1.0 / (jnp.sqrt(var) + CONSTANT)
        ms = jnp.stack([mean, istd], axis=-1)                        # (B, nfilt, 2)

        # ---- Pallas kernel 2: time-tiled normalize + mask (bandwidth-bound) ----
        kern2 = functools.partial(_apply_norm_kernel,
                                  pad_value=float(self.pad_value), tt=tt)
        out_full = pl.pallas_call(
            kern2,
            out_shape=jax.ShapeDtypeStruct((B, nfilt, T_pad), jnp.float32),
            grid_spec=pltpu.PrefetchScalarGridSpec(
                num_scalar_prefetch=1,
                grid=(B, n_tiles),
                in_specs=[
                    pl.BlockSpec((1, nfilt, tt), lambda b, t, seq: (b, 0, t)),
                    pl.BlockSpec((1, nfilt, 2), lambda b, t, seq: (b, 0, 0)),
                ],
                out_specs=pl.BlockSpec((1, nfilt, tt), lambda b, t, seq: (b, 0, t)),
            ),
            compiler_params=pltpu.CompilerParams(
                dimension_semantics=("parallel", "parallel")),
        )(seq_frames, logmel_cm, ms)

        # pad_to=16 output length (padded positions already hold pad_value).
        out = out_full[:, :, :T_out] if T_pad > T_out else out_full
        return out, seq_frames


# ----------------------------------------------------------------------------
# Pure-JAX reference (mirrors the PyTorch forward, same bf16-MXU precision choice)
# ----------------------------------------------------------------------------
def _reference(fbf, x, seq_len, key):
    B, L = x.shape
    hop, n_fft, win = fbf.hop_length, fbf.n_fft, fbf.win_length
    off, nf_pad, nfilt = fbf.frame_off, fbf.nf_pad, fbf.nfilt
    seq_frames = jnp.ceil(seq_len.astype(jnp.float32) / hop).astype(jnp.int32)
    if fbf.dither > 0:
        x = x + fbf.dither * jax.random.normal(key, x.shape, dtype=x.dtype)
    x = jnp.concatenate([x[:, :1], x[:, 1:] - fbf.preemph * x[:, :-1]], axis=1)
    x_pad = jnp.pad(x, ((0, 0), (n_fft // 2, n_fft // 2)), mode='reflect')
    T = 1 + L // hop
    idx = (np.arange(T) * hop)[:, None] + off + np.arange(win)[None, :]
    frames = x_pad[:, idx].astype(jnp.bfloat16)                      # (B, T, win)
    spec = jnp.einsum('btn,nk->btk', frames, fbf.dft_mat,
                      preferred_element_type=jnp.float32)
    re = spec[..., :nf_pad]
    im = spec[..., nf_pad:]
    power = re * re + im * im                                        # (B, T, nf_pad)
    mel = jnp.einsum('btf,fm->btm', power.astype(jnp.bfloat16), fbf.fb_t_pad,
                     preferred_element_type=jnp.float32)[..., :nfilt]
    xl = jnp.log(mel + fbf.log_zero_guard_value).transpose(0, 2, 1)  # (B, nfilt, T)
    # per_feature normalization over valid frames (unbiased std)
    t_idx = jnp.arange(T)[None, None, :]
    valid = t_idx < seq_frames[:, None, None]
    nfv = seq_frames.astype(jnp.float32)[:, None, None]
    mean = jnp.sum(jnp.where(valid, xl, 0.0), axis=2, keepdims=True) / nfv
    var = jnp.sum(jnp.where(valid, (xl - mean) ** 2, 0.0), axis=2,
                  keepdims=True) / (nfv - 1.0)
    y = (xl - mean) / (jnp.sqrt(var) + CONSTANT)
    y = jnp.where(valid, y, fbf.pad_value)
    T_out = _round_up(T, 16)
    y = jnp.pad(y, ((0, 0), (0, 0), (0, T_out - T)), constant_values=fbf.pad_value)
    return y


if __name__ == "__main__":
    key = jax.random.PRNGKey(0)
    k_x, k_dither = jax.random.split(key)

    B, L = 2, 1600                        # small: 0.1 s of 16 kHz audio per example
    x = jax.random.normal(k_x, (B, L), dtype=jnp.float32)
    seq_len = jnp.array([1600, 1280], dtype=jnp.int32)

    fbf = FilterbankFeaturesPallas()
    out, out_len = fbf(x, seq_len, k_dither)
    out = jax.block_until_ready(out)

    ref = jax.block_until_ready(_reference(fbf, x, seq_len, k_dither))
    assert out.shape == ref.shape, (out.shape, ref.shape)
    np.testing.assert_allclose(np.asarray(out), np.asarray(ref), rtol=5e-2, atol=5e-2)
    assert np.all(np.isfinite(np.asarray(out)))
    print("KERNEL_OK")
</pallas_src>

<mosaic_0001>
module attributes {stable_mosaic.version = 11 : i64} {
  func.func @_stft_mel_log_kernel(%arg0: i32, %arg1: i32, %arg2: memref<2xi32, #tpu.memory_space<smem>>, %arg3: memref<1x16x320xbf16, #tpu.memory_space<vmem>>, %arg4: memref<320x768xbf16, #tpu.memory_space<vmem>>, %arg5: memref<384x128xbf16, #tpu.memory_space<vmem>>, %arg6: memref<1x64x16xf32, #tpu.memory_space<vmem>>, %arg7: memref<1x1x2x128xf32, #tpu.memory_space<vmem>>) attributes {dimension_semantics = [#tpu.dimension_semantics<parallel>, #tpu.dimension_semantics<parallel>], iteration_bounds = array<i64: 2, 1>, scalar_prefetch = 1 : i64, scratch_operands = 0 : i64, tpu.core_type = #tpu.core_type<tc>, window_params = [{transform_indices = @transform_0, window_bounds = array<i64: 1, 16, 320>}, {pipeline_mode = #tpu.pipeline_mode<synchronous>, transform_indices = @transform_1, window_bounds = array<i64: 320, 768>}, {pipeline_mode = #tpu.pipeline_mode<synchronous>, transform_indices = @transform_2, window_bounds = array<i64: 384, 128>}, {transform_indices = @transform_3, window_bounds = array<i64: 1, 64, 16>}, {transform_indices = @transform_4, window_bounds = array<i64: 1, 1, 2, 128>}]} {
    %c0 = arith.constant 0 : index
    %c0_0 = arith.constant 0 : index
    %c0_1 = arith.constant 0 : index
    %0 = vector.load %arg3[%c0, %c0_0, %c0_1] : memref<1x16x320xbf16, #tpu.memory_space<vmem>>, vector<1x16x320xbf16>
    %1 = vector.shape_cast %0 : vector<1x16x320xbf16> to vector<16x320xbf16>
    %c0_2 = arith.constant 0 : index
    %c0_3 = arith.constant 0 : index
    %2 = vector.load %arg4[%c0_2, %c0_3] : memref<320x768xbf16, #tpu.memory_space<vmem>>, vector<320x768xbf16>
    %cst = arith.constant dense<0.000000e+00> : vector<16x768xf32>
    %3 = tpu.matmul %1, %2, %cst {dimension_numbers = #tpu.dot_dimension_numbers<[1], [0], [0], [1], [0, 0, 1, 1], [], []>} : vector<16x320xbf16>, vector<320x768xbf16>, vector<16x768xf32> -> vector<16x768xf32>
    %4 = vector.extract_strided_slice %3 {offsets = [0, 0], sizes = [16, 384], strides = [1, 1]} : vector<16x768xf32> to vector<16x384xf32>
    %5 = vector.extract_strided_slice %3 {offsets = [0, 384], sizes = [16, 384], strides = [1, 1]} : vector<16x768xf32> to vector<16x384xf32>
    %6 = arith.mulf %4, %4 : vector<16x384xf32>
    %7 = arith.mulf %5, %5 : vector<16x384xf32>
    %8 = arith.addf %6, %7 : vector<16x384xf32>
    %9 = arith.truncf %8 : vector<16x384xf32> to vector<16x384xbf16>
    %c0_4 = arith.constant 0 : index
    %c0_5 = arith.constant 0 : index
    %10 = vector.load %arg5[%c0_4, %c0_5] : memref<384x128xbf16, #tpu.memory_space<vmem>>, vector<384x128xbf16>
    %cst_6 = arith.constant dense<0.000000e+00> : vector<16x128xf32>
    %11 = tpu.matmul %9, %10, %cst_6 {dimension_numbers = #tpu.dot_dimension_numbers<[1], [0], [0], [1], [0, 0, 1, 1], [], []>} : vector<16x384xbf16>, vector<384x128xbf16>, vector<16x128xf32> -> vector<16x128xf32>
    %cst_7 = arith.constant 5.96046448E-8 : f32
    %12 = vector.broadcast %cst_7 : f32 to vector<16x128xf32>
    %13 = arith.addf %11, %12 : vector<16x128xf32>
    %14 = math.log %13 : vector<16x128xf32>
    %15 = tpu.transpose %14, [1, 0] : vector<16x128xf32> -> vector<128x16xf32>
    %16 = vector.extract_strided_slice %15 {offsets = [0, 0], sizes = [64, 16], strides = [1, 1]} : vector<128x16xf32> to vector<64x16xf32>
    %c0_8 = arith.constant 0 : index
    %c0_9 = arith.constant 0 : index
    %c0_10 = arith.constant 0 : index
    %17 = vector.load %arg6[%c0_8, %c0_9, %c0_10] : memref<1x64x16xf32, #tpu.memory_space<vmem>>, vector<1x64x16xf32>
    %18 = vector.shape_cast %17 : vector<1x64x16xf32> to vector<64x16xf32>
    %19 = vector.shape_cast %16 : vector<64x16xf32> to vector<1x64x16xf32>
    tpu.vector_store %arg6[%c0_8, %c0_9, %c0_10], %19 {strides = array<i32>} : memref<1x64x16xf32, #tpu.memory_space<vmem>>, vector<1x64x16xf32>,
    %20 = arith.index_cast %arg0 : i32 to index
    %21 = memref.load %arg2[%20] : memref<2xi32, #tpu.memory_space<smem>>
    %c16_i32 = arith.constant 16 : i32
    %22 = arith.muli %arg1, %c16_i32 : i32
    %23 = tpu.iota {dimensions = array<i32: 0>} : vector<16x1xi32>
    %24 = vector.broadcast %22 : i32 to vector<16x1xi32>
    %25 = arith.addi %24, %23 : vector<16x1xi32>
    %26 = vector.broadcast %21 : i32 to vector<16x1xi32>
    %27 = arith.cmpi slt, %25, %26 : vector<16x1xi32>
    %cst_11 = arith.constant 0.000000e+00 : f32
    %28 = vector.shape_cast %27 : vector<16x1xi1> to vector<16x1xi1>
    %29 = vector.broadcast %28 : vector<16x1xi1> to vector<16x128xi1>
    %30 = vector.broadcast %cst_11 : f32 to vector<16x128xf32>
    %31 = arith.select %29, %14, %30 : vector<16x128xi1>, vector<16x128xf32>
    %cst_12 = arith.constant dense<0.000000e+00> : vector<128xf32>
    %32 = vector.multi_reduction <add>, %31, %cst_12 [0] : vector<16x128xf32> to vector<128xf32>
    %33 = vector.shape_cast %32 : vector<128xf32> to vector<1x128xf32>
    %34 = arith.mulf %31, %31 : vector<16x128xf32>
    %cst_13 = arith.constant dense<0.000000e+00> : vector<128xf32>
    %35 = vector.multi_reduction <add>, %34, %cst_13 [0] : vector<16x128xf32> to vector<128xf32>
    %36 = vector.shape_cast %35 : vector<128xf32> to vector<1x128xf32>
    %37 = tpu.concatenate %33, %36 in 0 : vector<1x128xf32>, vector<1x128xf32> -> vector<2x128xf32>
    %c0_14 = arith.constant 0 : index
    %c0_15 = arith.constant 0 : index
    %c0_16 = arith.constant 0 : index
    %c0_17 = arith.constant 0 : index
    %38 = vector.load %arg7[%c0_14, %c0_15, %c0_16, %c0_17] : memref<1x1x2x128xf32, #tpu.memory_space<vmem>>, vector<1x1x2x128xf32>
    %39 = vector.shape_cast %38 : vector<1x1x2x128xf32> to vector<2x128xf32>
    %40 = vector.shape_cast %37 : vector<2x128xf32> to vector<1x1x2x128xf32>
    tpu.vector_store %arg7[%c0_14, %c0_15, %c0_16, %c0_17], %40 {strides = array<i32>} : memref<1x1x2x128xf32, #tpu.memory_space<vmem>>, vector<1x1x2x128xf32>,
    return
  }
  func.func @transform_0(%arg0: i32, %arg1: i32, %arg2: memref<2xi32, #tpu.memory_space<smem>>) -> (i32, i32, i32) {
    %c0_i32 = arith.constant 0 : i32
    %c0_i32_0 = arith.constant 0 : i32
    return %arg0, %arg1, %c0_i32 : i32, i32, i32
  }
  func.func @transform_1(%arg0: i32, %arg1: i32, %arg2: memref<2xi32, #tpu.memory_space<smem>>) -> (i32, i32) {
    %c0_i32 = arith.constant 0 : i32
    %c0_i32_0 = arith.constant 0 : i32
    %c0_i32_1 = arith.constant 0 : i32
    return %c0_i32, %c0_i32_0 : i32, i32
  }
  func.func @transform_2(%arg0: i32, %arg1: i32, %arg2: memref<2xi32, #tpu.memory_space<smem>>) -> (i32, i32) {
    %c0_i32 = arith.constant 0 : i32
    %c0_i32_0 = arith.constant 0 : i32
    %c0_i32_1 = arith.constant 0 : i32
    return %c0_i32, %c0_i32_0 : i32, i32
  }
  func.func @transform_3(%arg0: i32, %arg1: i32, %arg2: memref<2xi32, #tpu.memory_space<smem>>) -> (i32, i32, i32) {
    %c0_i32 = arith.constant 0 : i32
    %c0_i32_0 = arith.constant 0 : i32
    return %arg0, %c0_i32, %arg1 : i32, i32, i32
  }
  func.func @transform_4(%arg0: i32, %arg1: i32, %arg2: memref<2xi32, #tpu.memory_space<smem>>) -> (i32, i32, i32, i32) {
    %c0_i32 = arith.constant 0 : i32
    %c0_i32_0 = arith.constant 0 : i32
    %c0_i32_1 = arith.constant 0 : i32
    return %arg0, %arg1, %c0_i32, %c0_i32_0 : i32, i32, i32, i32
  }
}

</mosaic_0001>

<bundles_post_ra>
// kernel: tpu_custom_call.1
= control target key start
LH: loop header
LB: loop body
LE: loop exit
PB: predicated region body
PF: predicated region fallthrough
CT: control target
= control target key end

     0   :  { %s2899_s0 = inlined_call_operand.hbm [shape: s32[2], index: 0, kind: input, shape index: {}]   ;;  %s2900_s1 = inlined_call_operand.hbm [shape: bf16[2,16,320], index: 1, kind: input, shape index: {}]   ;;  %s2901_s2 = inlined_call_operand.hbm [shape: bf16[320,768], index: 2, kind: input, shape index: {}]   ;;  %s2902_s3 = inlined_call_operand.hbm [shape: bf16[384,128], index: 3, kind: input, shape index: {}]   ;;  %s2903_s4 = inlined_call_operand.vmem [shape: f32[2,64,16], index: 4, kind: output, shape index: {0}]   ;;  %s2904_s5 = inlined_call_operand.hbm [shape: f32[2,1,2,128], index: 5, kind: output, shape index: {1}]  }
   0x1   :  { %s2371_s20 = scalar_lea.hbm %s2899_s0, 16 }
   0x2   :  { %p2372_p0 = scmp.ne.s32.totalorder %s2899_s0, %s2371_s20  ;;  %p2375_p1 = scmp.lt.u32.totalorder %s2371_s20, %s2899_s0 }
   0x4   :  { %p2377_p2 = pnand %p2375_p1, %p2372_p0 }
   0x6   :  { %2380 = shalt.err (!%p2377_p2)  }
   0x7   :  { %s2557_s25 = smov [#allocation3]  }
   0x8   :  { %12 = dma.hbm_to_smem %s2899_s0, 16, %s2557_s25, [#allocation2] }
   0x9   :  { %2519 = dma.done.wait [#allocation2], 16 }
   0xa   :  { %2520 = vsyncadd [#allocation2], 4294967280 }
   0xb   :  { %14 = sfence }
   0xc   :  { %15 = vsyncpa [#allocation5], 0 }
   0xd   :  { %17 = vsyncpa [#allocation5 + $0x1], 0 }
   0xe   :  { %18 = vsyncpa [#allocation8], 0 }
   0xf   :  { %19 = vsyncpa [#allocation6], 0 }
  0x10   :  { %21 = vsyncpa [#allocation6 + $0x1], 0  ;;  %s2613_s28 = smov 0   ;;  %s2615_s29 = smov 0  }
  0x11   :  { %s2617_s30 = smov 0   ;;  %s2619_s6 = smov 0  }
  0x12   :  { %s2621_s7 = smov 0   ;;  %s2623_s8 = smov 0  }
  0x13 LB: > { %s1832_s0 = sadd.s32 4294967295, %s2555_s8   ;;  %s1833_s9 = sadd.s32 4294967294, %s2555_s8   ;;  %s2555_s8 = sphi %s2623_s8, %s27_s8   ;;  %s2551_s7 = sphi %s2621_s7, %s2926_s7   ;;  %s2547_s6 = sphi %s2619_s6, %s2925_s6   ;;  %s2543_s30 = sphi %s2617_s30, %s2924_s30   ;;  %s2539_s29 = sphi %s2615_s29, %s2923_s29   ;;  %s2535_s28 = sphi %s2613_s28, %s2922_s28  }
  0x14   : > { %p61_p3 = scmp.ne.s32.totalorder %s2539_s29, %s2535_s28  ;;  %p2647_p4 = scmp.eq.s32.totalorder %s1832_s0, 0 }
  0x15   : > { %p2651_p5 = scmp.eq.s32.totalorder %s1832_s0, 1  ;;  %p163_p6 = scmp.eq.s32.totalorder %s1833_s9, 1 }
  0x16   : > { %s2909_s10 = scalar_select %p2647_p4, 1, 0 }
  0x17   : > { %p2657_p7 = por %p2647_p4, %p61_p3  ;;  %p1834_p8 = scmp.ge.s32.totalorder %s2555_s8, 1 }
  0x18   : > { %p2662_p9 = por %p163_p6, %p61_p3  ;;  %p170_p10 = scmp.lt.s32.totalorder %s2555_s8, 3 }
  0x19   : > { %s2911_s12 = scalar_select %p2657_p7, 1, 0 }
  0x1a   : > { %s2912_s13 = scalar_select %p2662_p9, 1, 0 }
  0x1b   : > { %p2667_p11 = pnand %p1834_p8, %p170_p10  ;;  %s2558_s15 = smov [#allocation7]  }
  0x1c   : > { %s182_s16 = sshll.u32 %s2558_s15, 4  ;;  %s2559_s18 = smov [#allocation9]   ;;  %s2671_s16 = int_to_ptr.vmem [resolvable:$true] %s182_s16 }
  0x1d   : > { %p2078_p12 = pneg %p2667_p11  ;;  %s195_s19 = sshll.u32 %s2559_s18, 4  ;;  %s2682_s19 = int_to_ptr.vmem [resolvable:$true] %s195_s19 }
  0x1e   : > { %s2381_s22 = scalar_lea.hbm %s2901_s2, 15360 }
  0x1f   : > { %p2678_p0 = pnand %p2078_p12, %p2647_p4  ;;  %p2382_p1 = scmp.ne.s32.totalorder %s2901_s2, %s2381_s22 }
  0x20   : > { %p2388_p8 = scmp.lt.u32.totalorder %s2381_s22, %s2901_s2 }
  0x21   : > { %p2383_p2 = pneg %p2678_p0 }
  0x23   : > { %p2384_p3 = pnand %p2383_p2, %p2382_p1 }
  0x25   : > { %p2385_p6 = pneg %p2384_p3 }
  0x27   : > { %p2390_p10 = pnand %p2388_p8, %p2385_p6 }
  0x29   : > { %2393 = shalt.err (!%p2390_p10)
}
  0x2a   : > { %s2394_s27 = scalar_lea.vmem %s2671_s16, 15360  ;;  %p2402_p4 = scmp.lt.s32.totalorder %s2671_s16, %s2671_s16 }
  0x2b   : > { %p2395_p12 = scmp.ne.s32.totalorder %s2671_s16, %s2394_s27  ;;  %p2403_p1 = scmp.lt.s32.totalorder %s2394_s27, %s2394_s27 }
  0x2d   : > { %p2397_p13 = pnand %p2395_p12, %p2383_p2  ;;  %p2404_p3 = por %p2403_p1, %p2402_p4 }
  0x2f   : > { %p2398_p9 = pneg %p2397_p13 }
  0x31   : > { %p2405_p7 = pnand %p2404_p3, %p2398_p9 }
  0x33   : > { %2408 = shalt.err (!%p2405_p7)
}
  0x34   : > { %s2560_s0 = smov 384   ;;  %s2561_s9 = smov 24  }
  0x35   : > { %2081 = dma.hbm_to_vmem [thread:$0]  (!%p2678_p0), %s2901_s2, 15360, %s2671_s16, [#allocation8], %s2560_s0, %s2560_s0, %s2561_s9  }
  0x36   : > { %s2409_s22 = scalar_lea.hbm %s2902_s3, 3072 }
  0x37   : > { %p2410_p4 = scmp.ne.s32.totalorder %s2902_s3, %s2409_s22  ;;  %p2416_p13 = scmp.lt.u32.totalorder %s2409_s22, %s2902_s3 }
  0x39   : > { %p2412_p7 = pnand %p2410_p4, %p2383_p2 }
  0x3b   : > { %p2413_p9 = pneg %p2412_p7 }
  0x3d   : > { %p2418_p6 = pnand %p2416_p13, %p2413_p9 }
  0x3f   : > { %2421 = shalt.err (!%p2418_p6)
}
  0x40   : > { %s2422_s16 = scalar_lea.vmem %s2682_s19, 3072  ;;  %p2430_p1 = scmp.lt.s32.totalorder %s2682_s19, %s2682_s19 }
  0x41   : > { %p2423_p8 = scmp.ne.s32.totalorder %s2682_s19, %s2422_s16  ;;  %p2431_p3 = scmp.lt.s32.totalorder %s2422_s16, %s2422_s16 }
  0x43   : > { %p2425_p10 = pnand %p2423_p8, %p2383_p2  ;;  %p2432_p4 = por %p2431_p3, %p2430_p1 }
  0x45   : > { %p2426_p12 = pneg %p2425_p10 }
  0x47   : > { %p2433_p7 = pnand %p2432_p4, %p2426_p12 }
  0x49   : > { %2436 = shalt.err (!%p2433_p7)
}
  0x4a   : > { %s2562_s27 = smov 64   ;;  %s2563_s0 = smov 4  }
  0x4b   : > { %2084 = dma.hbm_to_vmem [thread:$0]  (!%p2678_p0), %s2902_s3, 3072, %s2682_s19, [#allocation8], %s2562_s27, %s2562_s27, %s2563_s0  }
  0x4c   : > { %s39_s18 = sadd.s32 1, %s2551_s7  ;;  %s48_s20 = sadd.s32 1, %s2543_s30 }
  0x4d   : > { %p41_p2 = scmp.ge.s32.totalorder %s39_s18, 2  ;;  %p55_p9 = scmp.ne.s32.totalorder %s2543_s30, %s2539_s29 }
  0x4e   : > { %p56_p13 = scmp.eq.s32.totalorder %s2555_s8, 0  ;;  %p2095_p6 = scmp.lt.s32.totalorder %s2555_s8, 2 }
  0x4f   : > { %s2928_s18 = smov (%p41_p2, %s39_s18), 0  ;;  %p2746_p10 = por %p2651_p5, %p55_p9 }
  0x50   : > { %p57_p8 = por %p56_p13, %p55_p9  ;;  %s43_s17 = ssub.s32 %s2551_s7, %s2928_s18 }
  0x51   : > { %s2915_s21 = scalar_select %p2746_p10, 1, 0 }
  0x52   : > { %s209_s22 = sand.u32 1, %s2543_s30   ;;  %p46_p12 = scmp.eq.s32.totalorder %s43_s17, 0 }
  0x53   : > { %s2063_s19 = smul.u32 24, %s209_s22  ;;  %p2753_p0 = pnand %p2095_p6, %p57_p8 }
  0x54   : > { %s2758_s24 = scalar_select %p46_p12, %s2543_s30, %s48_s20  }
  0x55   : > { %s2064_s25 = smul.u32 384, %s2551_s7  ;;  %s213_s26 = scalar_lea.vmem [#allocation4], %s2063_s19 }
  0x56   : > { %s223_s16 = sshll.u32 %s213_s26, 4  ;;  %s2768_s9 = scalar_lea.sflag [#allocation5], %s209_s22  ;;  %s2766_s16 = int_to_ptr.vmem [resolvable:$true] %s223_s16 }
  0x57   : > { %s2764_s0 = scalar_lea.hbm %s2900_s1, %s2064_s25  ;;  %p2439_p1 = pneg %p2753_p0 }
  0x58   : > { %s2437_s15 = scalar_lea.hbm %s2764_s0, 384  ;;  %s2442_s19 = scalar_lea.hbm %s2900_s1, 768 }
  0x59   : > { %p2438_p5 = scmp.ne.s32.totalorder %s2764_s0, %s2437_s15  ;;  %p2443_p7 = scmp.lt.u32.totalorder %s2764_s0, %s2900_s1 }
  0x5a   : > { %p2444_p2 = scmp.lt.u32.totalorder %s2442_s19, %s2437_s15  ;;  %p2446_p13 = scmp.lt.u32.totalorder %s2437_s15, %s2764_s0 }
  0x5b   : > { %p2440_p3 = pnand %p2439_p1, %p2438_p5 }
  0x5c   : > { %p2445_p9 = por %p2444_p2, %p2443_p7 }
  0x5d   : > { %p2441_p4 = pneg %p2440_p3 }
  0x5e   : > { %p2447_p6 = por %p2446_p13, %p2445_p9 }
  0x60   : > { %p2448_p8 = pnand %p2447_p6, %p2441_p4 }
  0x62   : > { %2451 = shalt.err (!%p2448_p8)
}
  0x63   : > { %s2452_s22 = scalar_lea.vmem %s2766_s16, 384  ;;  %s2564_s11 = smov [#allocation4]  }
  0x64   : > { %p2453_p12 = scmp.ne.s32.totalorder %s2766_s16, %s2452_s22  ;;  %s2457_s27 = sshll.u32 %s2564_s11, 4  ;;  %s2458_s27 = int_to_ptr.vmem [resolvable:$false] %s2457_s27 }
  0x65   : > { %s2459_s20 = scalar_lea.vmem %s2458_s27, 768  ;;  %p2460_p10 = scmp.lt.s32.totalorder %s2766_s16, %s2458_s27 }
  0x66   : > { %p2455_p5 = pnand %p2453_p12, %p2439_p1  ;;  %p2461_p7 = scmp.lt.s32.totalorder %s2459_s20, %s2452_s22 }
  0x68   : > { %p2456_p3 = pneg %p2455_p5  ;;  %p2462_p2 = por %p2461_p7, %p2460_p10 }
  0x6a   : > { %p2463_p9 = pnand %p2462_p2, %p2456_p3 }
  0x6c   : > { %2466 = shalt.err (!%p2463_p9)
}
  0x6d   : > { %s2565_s15 = smov 192   ;;  %s2566_s17 = smov 12  }
  0x6e   : > { %2088 = dma.hbm_to_vmem [thread:$0]  (!%p2753_p0), %s2764_s0, 384, %s2766_s16, %s2768_s9, %s2565_s15, %s2565_s15, %s2566_s17  }
  0x6f   : > { %235 = sbr.rel (%p2667_p11) target bundleno = 921 (0x399), region = 32  ;;  %s2799_s19 = sand.u32 (!%p2667_p11), 1, %s2539_s29  }
  0x70   : > { %s2065_s25 = smul.u32 (!%p2667_p11), 24, %s2799_s19  ;;  %s238_s26 = scalar_lea.sflag (!%p2667_p11), [#allocation5], %s2799_s19 }
  0x71   : > { %p2917_p10 = scmp.ne.s32.totalorder (!%p2667_p11), %s2911_s12, 0 }
  0x72   : > { %s2803_s22 = scalar_lea.vmem (!%p2667_p11), [#allocation4], %s2065_s25 }
  0x76   : > { %2522 = dma.done.wait (%p2917_p10), %s238_s26, 384  }
  0x77   : > { %2524 = vsyncadd (%p2917_p10), %s238_s26, 4294966912  ;;  %p2918_p0 = scmp.ne.s32.totalorder %s2909_s10, 0 }
  0x79   : > { %2526 = dma.done.wait (%p2918_p0), [#allocation8], 18432  }
  0x7a   : > { %2528 = vsyncadd (%p2918_p0), [#allocation8], 4294948864  ;;  %v2159_v0 = vld [vmem:[#allocation7 + $0x4] ss:$24 sps:$4 sm:$0xff]   ;;  %v2163_v2 = vld [vmem:[#allocation7] ss:$24 sps:$4 sm:$0xff]  }
  0x7b   : > { %v2161_v1 = vld [vmem:[#allocation7 + $0xc] ss:$24 sps:$4 sm:$0xff]   ;;  %1035 = vmatprep.subr.bf16.mxu0 %v2159_v0  ;;  %v2164_v3 = vld [vmem:[#allocation7 + $0x8] ss:$24 sps:$4 sm:$0xff]   ;;  %v2167_v5 = vld [vmem:[#allocation7 + $0x3c] ss:$24 sps:$4 sm:$0xff]  }
  0x7c   : > { %1121 = vmatprep.subr.bf16.mxu1 %v2161_v1  ;;  %v2165_v4 = vld [vmem:[#allocation7 + $0x34] ss:$24 sps:$4 sm:$0xff]   ;;  %1036 = vmatpush1.bf16.msra.mxu0 %v2163_v2  ;;  %v2169_v6 = vld [vmem:[#allocation7 + $0x30] ss:$24 sps:$4 sm:$0xff]   ;;  %v2171_v8 = vld [vmem:[#allocation7 + $0x64] ss:$24 sps:$4 sm:$0xff]  }
  0x7d   : > { %1122 = vmatpush1.bf16.msra.mxu1 %v2164_v3  ;;  %1037 = vmatprep.subr.bf16.mxu0 %v2165_v4  ;;  %v2170_v7 = vld [vmem:[#allocation7 + $0x38] ss:$24 sps:$4 sm:$0xff]   ;;  %v2173_v9 = vld [vmem:[#allocation7 + $0x6c] ss:$24 sps:$4 sm:$0xff]   ;;  %v2176_v11 = vld [vmem:[#allocation7 + $0x68] ss:$24 sps:$4 sm:$0xff]  }
  0x7e   : > { %1123 = vmatprep.subr.bf16.mxu1 %v2167_v5  ;;  %v2175_v10 = vld [vmem:[#allocation7 + $0x60] ss:$24 sps:$4 sm:$0xff]   ;;  %v2177_v12 = vld [vmem:[#allocation7 + $0x94] ss:$24 sps:$4 sm:$0xff]   ;;  %v2181_v14 = vld [vmem:[#allocation7 + $0x90] ss:$24 sps:$4 sm:$0xff]  }
  0x7f   : > { %v2179_v13 = vld [vmem:[#allocation7 + $0x9c] ss:$24 sps:$4 sm:$0xff]   ;;  %v2182_v15 = vld [vmem:[#allocation7 + $0x98] ss:$24 sps:$4 sm:$0xff]   ;;  %v2185_v17 = vld [vmem:[#allocation7 + $0xcc] ss:$24 sps:$4 sm:$0xff]  }
  0x80   : > { %1038 = vmatpush1.bf16.msra.mxu0 %v2169_v6  ;;  %v2183_v16 = vld [vmem:[#allocation7 + $0xc4] ss:$24 sps:$4 sm:$0xff]   ;;  %v2187_v18 = vld [vmem:[#allocation7 + $0xc0] ss:$24 sps:$4 sm:$0xff]   ;;  %v2189_v20 = vld [vmem:[#allocation7 + $0xf4] ss:$24 sps:$4 sm:$0xff]  }
  0x81   : > { %1124 = vmatpush1.bf16.msra.mxu1 %v2170_v7  ;;  %1039 = vmatprep.subr.bf16.mxu0 %v2171_v8  ;;  %v2188_v19 = vld [vmem:[#allocation7 + $0xc8] ss:$24 sps:$4 sm:$0xff]   ;;  %v2191_v21 = vld [vmem:[#allocation7 + $0xfc] ss:$24 sps:$4 sm:$0xff]   ;;  %v2194_v23 = vld [vmem:[#allocation7 + $0xf8] ss:$24 sps:$4 sm:$0xff]  }
  0x82   : > { %1125 = vmatprep.subr.bf16.mxu1 %v2173_v9  ;;  %v2193_v22 = vld [vmem:[#allocation7 + $0xf0] ss:$24 sps:$4 sm:$0xff]   ;;  %v2195_v24 = vld [vmem:[#allocation7 + $0x124] ss:$24 sps:$4 sm:$0xff]   ;;  %v2199_v26 = vld [vmem:[#allocation7 + $0x120] ss:$24 sps:$4 sm:$0xff]  }
  0x83   : > { %v2197_v25 = vld [vmem:[#allocation7 + $0x12c] ss:$24 sps:$4 sm:$0xff]   ;;  %v2200_v27 = vld [vmem:[#allocation7 + $0x128] ss:$24 sps:$4 sm:$0xff]   ;;  %v2203_v29 = vld [vmem:[#allocation7 + $0x15c] ss:$24 sps:$4 sm:$0xff]  }
  0x84   : > { %1040 = vmatpush1.bf16.msra.mxu0 %v2175_v10  ;;  %v2201_v28 = vld [vmem:[#allocation7 + $0x154] ss:$24 sps:$4 sm:$0xff]   ;;  %v2205_v30 = vld [vmem:[#allocation7 + $0x150] ss:$24 sps:$4 sm:$0xff]   ;;  %v2207_v32 = vld [vmem:[#allocation7 + $0x184] ss:$24 sps:$4 sm:$0xff]  }
  0x85   : > { %1126 = vmatpush1.bf16.msra.mxu1 %v2176_v11  ;;  %1041 = vmatprep.subr.bf16.mxu0 %v2177_v12  ;;  %v2206_v31 = vld [vmem:[#allocation7 + $0x158] ss:$24 sps:$4 sm:$0xff]   ;;  %v2209_v33 = vld [vmem:[#allocation7 + $0x18c] ss:$24 sps:$4 sm:$0xff]   ;;  %v2212_v35 = vld [vmem:[#allocation7 + $0x188] ss:$24 sps:$4 sm:$0xff]  }
  0x86   : > { %1127 = vmatprep.subr.bf16.mxu1 %v2179_v13  ;;  %v2211_v34 = vld [vmem:[#allocation7 + $0x180] ss:$24 sps:$4 sm:$0xff]   ;;  %v2213_v36 = vld [vmem:[#allocation7 + $0x1b4] ss:$24 sps:$4 sm:$0xff]   ;;  %v2217_v38 = vld [vmem:[#allocation7 + $0x1b0] ss:$24 sps:$4 sm:$0xff]  }
  0x87   : > { %v2215_v37 = vld [vmem:[#allocation7 + $0x1bc] ss:$24 sps:$4 sm:$0xff]   ;;  %v2218_v39 = vld [vmem:[#allocation7 + $0x1b8] ss:$24 sps:$4 sm:$0xff]   ;;  %v2221_v41 = vld [vmem:[#allocation7 + $0x1ec] ss:$24 sps:$4 sm:$0xff]  }
  0x88   : > { %1042 = vmatpush1.bf16.msra.mxu0 %v2181_v14  ;;  %v2219_v40 = vld [vmem:[#allocation7 + $0x1e4] ss:$24 sps:$4 sm:$0xff]   ;;  %v2223_v42 = vld [vmem:[#allocation7 + $0x1e0] ss:$24 sps:$4 sm:$0xff]   ;;  %v2225_v44 = vld [vmem:[#allocation7 + $0x214] ss:$24 sps:$4 sm:$0xff]  }
  0x89   : > { %1128 = vmatpush1.bf16.msra.mxu1 %v2182_v15  ;;  %1043 = vmatprep.subr.bf16.mxu0 %v2183_v16  ;;  %v2224_v43 = vld [vmem:[#allocation7 + $0x1e8] ss:$24 sps:$4 sm:$0xff]   ;;  %v2227_v45 = vld [vmem:[#allocation7 + $0x21c] ss:$24 sps:$4 sm:$0xff]   ;;  %v2230_v48 = vld [vmem:[#allocation7 + $0x218] ss:$24 sps:$4 sm:$0xff]  }
  0x8a   : > { %1129 = vmatprep.subr.bf16.mxu1 %v2185_v17  ;;  %v2229_v46 = vld [vmem:[#allocation7 + $0x210] ss:$24 sps:$4 sm:$0xff]   ;;  %v2814_v47 = vld [vmem:[%s2803_s22 + $0x4] ss:$12 sps:$4 sm:$0xff]   ;;  %v2231_v49 = vld [vmem:[#allocation7 + $0x244] ss:$24 sps:$4 sm:$0xff]  }
  0x8b   : > { %v2233_v50 = vld [vmem:[#allocation7 + $0x24c] ss:$24 sps:$4 sm:$0xff]   ;;  %1067 = vmatprep.mubr.bf16.mxu0 %v2814_v47  ;;  %1153 = vmatprep.mubr.bf16.mxu1 %v2814_v47  ;;  %v2235_v51 = vld [vmem:[#allocation7 + $0x240] ss:$24 sps:$4 sm:$0xff]   ;;  %v2239_v54 = vld [vmem:[#allocation7 + $0x27c] ss:$24 sps:$4 sm:$0xff]  }
  0x8c   : > { %1044 = vmatpush1.bf16.msra.mxu0 %v2187_v18  ;;  %v2236_v52 = vld [vmem:[#allocation7 + $0x248] ss:$24 sps:$4 sm:$0xff]   ;;  %v2237_v53 = vld [vmem:[#allocation7 + $0x274] ss:$24 sps:$4 sm:$0xff]   ;;  %v2242_v56 = vld [vmem:[#allocation7 + $0x278] ss:$24 sps:$4 sm:$0xff]  }
  0x8d   : > { %1130 = vmatpush1.bf16.msra.mxu1 %v2188_v19  ;;  %1045 = vmatprep.subr.bf16.mxu0 %v2189_v20  ;;  %v2241_v55 = vld [vmem:[#allocation7 + $0x270] ss:$24 sps:$4 sm:$0xff]   ;;  %v2243_v57 = vld [vmem:[#allocation7 + $0x2a4] ss:$24 sps:$4 sm:$0xff]   ;;  %v2247_v59 = vld [vmem:[#allocation7 + $0x2a0] ss:$24 sps:$4 sm:$0xff]  }
  0x8e   : > { %1131 = vmatprep.subr.bf16.mxu1 %v2191_v21  ;;  %v2245_v58 = vld [vmem:[#allocation7 + $0x2ac] ss:$24 sps:$4 sm:$0xff]   ;;  %v2248_v60 = vld [vmem:[#allocation7 + $0x2a8] ss:$24 sps:$4 sm:$0xff]   ;;  %v2251_v62 = vld [vmem:[#allocation7 + $0x2dc] ss:$24 sps:$4 sm:$0xff]  }
  0x8f   : > { %v2249_v61 = vld [vmem:[#allocation7 + $0x2d4] ss:$24 sps:$4 sm:$0xff]   ;;  %v2253_v63 = vld [vmem:[#allocation7 + $0x2d0] ss:$24 sps:$4 sm:$0xff]   ;;  %v2259_v1 = vld [vmem:[#allocation7 + $0x304] ss:$24 sps:$4 sm:$0xff]  }
  0x90   : > { %1046 = vmatpush1.bf16.msra.mxu0 %v2193_v22  ;;  %v2254_v0 = vld [vmem:[#allocation7 + $0x2d8] ss:$24 sps:$4 sm:$0xff]   ;;  %v2262_v2 = vld [vmem:[#allocation7 + $0x30c] ss:$24 sps:$4 sm:$0xff]   ;;  %v2260_v5 = vld [vmem:[#allocation7 + $0x308] ss:$24 sps:$4 sm:$0xff]  }
  0x91   : > { %1132 = vmatpush1.bf16.msra.mxu1 %v2194_v23  ;;  %1047 = vmatprep.subr.bf16.mxu0 %v2195_v24  ;;  %v2257_v3 = vld [vmem:[#allocation7 + $0x300] ss:$24 sps:$4 sm:$0xff]   ;;  %v2819_v4 = vld [vmem:[%s2803_s22] ss:$12 sps:$4 sm:$0xff]   ;;  %v2275_v11 = vld [vmem:[#allocation7 + $0x36c] ss:$24 sps:$4 sm:$0xff]  }
  0x92   : > { %1133 = vmatprep.subr.bf16.mxu1 %v2197_v25  ;;  %v2266_v6 = vld [vmem:[#allocation7 + $0x334] ss:$24 sps:$4 sm:$0xff]   ;;  %v2264_v8 = vld [vmem:[#allocation7 + $0x330] ss:$24 sps:$4 sm:$0xff]   ;;  %v2272_v10 = vld [vmem:[#allocation7 + $0x364] ss:$24 sps:$4 sm:$0xff]  }
  0x93   : > { %v2269_v7 = vld [vmem:[#allocation7 + $0x33c] ss:$24 sps:$4 sm:$0xff]   ;;  %v2267_v9 = vld [vmem:[#allocation7 + $0x338] ss:$24 sps:$4 sm:$0xff]   ;;  %v2567_v12 = vmov 0   ;;  %vm1031_vm0 = vcmask 523264  }
  0x94   : > { %1048 = vmatpush1.bf16.msra.mxu0 %v2199_v26  ;;  %v2270_v13 = vld [vmem:[#allocation7 + $0x360] ss:$24 sps:$4 sm:$0xff]   ;;  %v2278_v15 = vld [vmem:[#allocation7 + $0x394] ss:$24 sps:$4 sm:$0xff]   ;;  %v2276_v17 = vld [vmem:[#allocation7 + $0x390] ss:$24 sps:$4 sm:$0xff]  }
  0x95   : > { %1134 = vmatpush1.bf16.msra.mxu1 %v2200_v27  ;;  %1049 = vmatprep.subr.bf16.mxu0 %v2201_v28  ;;  %v2273_v14 = vld [vmem:[#allocation7 + $0x368] ss:$24 sps:$4 sm:$0xff]   ;;  %v2281_v16 = vld [vmem:[#allocation7 + $0x39c] ss:$24 sps:$4 sm:$0xff]   ;;  %v2279_v18 = vld [vmem:[#allocation7 + $0x398] ss:$24 sps:$4 sm:$0xff]  }
  0x96   : > { %1135 = vmatprep.subr.bf16.mxu1 %v2203_v29  ;;  %v2285_v19 = vld [vmem:[#allocation7 + $0x14] ss:$24 sps:$4 sm:$0xff]   ;;  %v2826_v20 = vld [vmem:[%s2803_s22 + $0x8] ss:$12 sps:$4 sm:$0xff]   ;;  %vm2569_vm1 = vmmov 0   ;;  %s1633_s10 = sld [smem:[#allocation3 + %s2547_s6]] }
  0x97   : > { %v2283_v21 = vld [vmem:[#allocation7 + $0x10] ss:$24 sps:$4 sm:$0xff]   ;;  %v2288_v22 = vld [vmem:[#allocation7 + $0x44] ss:$24 sps:$4 sm:$0xff]   ;;  %v2286_v23 = vld [vmem:[#allocation7 + $0x40] ss:$24 sps:$4 sm:$0xff]  }
  0x98   : > { %1050 = vmatpush1.bf16.msra.mxu0 %v2205_v30  ;;  %v2291_v24 = vld [vmem:[#allocation7 + $0x74] ss:$24 sps:$4 sm:$0xff]   ;;  %v2289_v25 = vld [vmem:[#allocation7 + $0x70] ss:$24 sps:$4 sm:$0xff]   ;;  %v2294_v26 = vld [vmem:[#allocation7 + $0xa4] ss:$24 sps:$4 sm:$0xff]  }
  0x99   : > { %1136 = vmatpush1.bf16.msra.mxu1 %v2206_v31  ;;  %1051 = vmatprep.subr.bf16.mxu0 %v2207_v32  ;;  %v2292_v27 = vld [vmem:[#allocation7 + $0xa0] ss:$24 sps:$4 sm:$0xff]   ;;  %v2297_v28 = vld [vmem:[#allocation7 + $0xd4] ss:$24 sps:$4 sm:$0xff]   ;;  %v2295_v29 = vld [vmem:[#allocation7 + $0xd0] ss:$24 sps:$4 sm:$0xff]  }
  0x9a   : > { %1137 = vmatprep.subr.bf16.mxu1 %v2209_v33  ;;  %v2300_v30 = vld [vmem:[#allocation7 + $0x104] ss:$24 sps:$4 sm:$0xff]   ;;  %v2298_v31 = vld [vmem:[#allocation7 + $0x100] ss:$24 sps:$4 sm:$0xff]   ;;  %v2303_v32 = vld [vmem:[#allocation7 + $0x134] ss:$24 sps:$4 sm:$0xff]  }
  0x9b   : > { %v2301_v33 = vld [vmem:[#allocation7 + $0x130] ss:$24 sps:$4 sm:$0xff]   ;;  %s1842_s12 = sshll.u32 %s2799_s19, 1  ;;  %vm1666_vm4 = vcmask 1040384   ;;  %s1996_s23 = sshll.u32 %s2547_s6, 5 }
  0x9c   : > { %1052 = vmatpush1.bf16.msra.mxu0 %v2211_v34  ;;  %v2306_v34 = vld [vmem:[#allocation7 + $0x164] ss:$24 sps:$4 sm:$0xff]   ;;  %s281_s14 = scalar_lea.vmem [#allocation10], %s1842_s12  ;;  %s2843_s11 = scalar_lea.hbm %s2904_s5, %s1996_s23 }
  0x9d   : > { %1138 = vmatpush1.bf16.msra.mxu1 %v2212_v35  ;;  %1053 = vmatprep.subr.bf16.mxu0 %v2213_v36  ;;  %v2304_v35 = vld [vmem:[#allocation7 + $0x160] ss:$24 sps:$4 sm:$0xff]   ;;  %v2309_v36 = vld [vmem:[#allocation7 + $0x194] ss:$24 sps:$4 sm:$0xff]   ;;  %s1695_s16 = sshll.u32 %s281_s14, 4  ;;  %s1678_s27 = scalar_lea.sflag [#allocation6], %s2799_s19  ;;  %s1696_s16 = int_to_ptr.vmem [resolvable:$true] %s1695_s16 }
  0x9e   : > { %1139 = vmatprep.subr.bf16.mxu1 %v2215_v37  ;;  %v2307_v37 = vld [vmem:[#allocation7 + $0x190] ss:$24 sps:$4 sm:$0xff]   ;;  %s2467_s20 = scalar_lea.vmem %s1696_s16, 32  ;;  %p2919_p1 = scmp.ne.s32.totalorder %s2915_s21, 0 }
  0x9f   : > { %p2468_p11 = scmp.ne.s32.totalorder %s1696_s16, %s2467_s20  ;;  %s2570_s15 = smov [#allocation10]  }
  0xa0   : > { %1054 = vmatpush1.bf16.msra.mxu0 %v2217_v38  ;;  %v2312_v38 = vld [vmem:[#allocation7 + $0x1c4] ss:$24 sps:$4 sm:$0xff]   ;;  %s2471_s17 = sshll.u32 %s2570_s15, 4  ;;  %s2472_s17 = int_to_ptr.vmem [resolvable:$false] %s2471_s17 }
  0xa1   : > { %1140 = vmatpush1.bf16.msra.mxu1 %v2218_v39  ;;  %1055 = vmatprep.subr.bf16.mxu0 %v2219_v40  ;;  %v2310_v39 = vld [vmem:[#allocation7 + $0x1c0] ss:$24 sps:$4 sm:$0xff]   ;;  %v2315_v40 = vld [vmem:[#allocation7 + $0x1f4] ss:$24 sps:$4 sm:$0xff]   ;;  %p2469_p4 = pnand %p2468_p11, %p2919_p1  ;;  %s2473_s25 = scalar_lea.vmem %s2472_s17, 64 }
  0xa2   : > { %1141 = vmatprep.subr.bf16.mxu1 %v2221_v41  ;;  %v2313_v41 = vld [vmem:[#allocation7 + $0x1f0] ss:$24 sps:$4 sm:$0xff]   ;;  %p2474_p6 = scmp.lt.s32.totalorder %s1696_s16, %s2472_s17  ;;  %p2475_p8 = scmp.lt.s32.totalorder %s2473_s25, %s2467_s20 }
  0xa3   : > { %p2470_p13 = pneg %p2469_p4 }
  0xa4   : > { %1056 = vmatpush1.bf16.msra.mxu0 %v2223_v42  ;;  %v2318_v42 = vld [vmem:[#allocation7 + $0x224] ss:$24 sps:$4 sm:$0xff]   ;;  %p2476_p12 = por %p2475_p8, %p2474_p6 }
  0xa5   : > { %1142 = vmatpush1.bf16.msra.mxu1 %v2224_v43  ;;  %1057 = vmatprep.subr.bf16.mxu0 %v2225_v44  ;;  %v2316_v43 = vld [vmem:[#allocation7 + $0x220] ss:$24 sps:$4 sm:$0xff]   ;;  %v2321_v44 = vld [vmem:[#allocation7 + $0x254] ss:$24 sps:$4 sm:$0xff]  }
  0xa6   : > { %1143 = vmatprep.subr.bf16.mxu1 %v2227_v45  ;;  %v2319_v45 = vld [vmem:[#allocation7 + $0x250] ss:$24 sps:$4 sm:$0xff]   ;;  %p2477_p5 = pnand %p2476_p12, %p2470_p13 }
  0xa8   : > { %1058 = vmatpush1.bf16.msra.mxu0 %v2229_v46  ;;  %v2324_v46 = vld [vmem:[#allocation7 + $0x284] ss:$24 sps:$4 sm:$0xff]  }
  0xa9   : > { %1144 = vmatpush1.bf16.msra.mxu1 %v2230_v48  ;;  %1059 = vmatprep.subr.bf16.mxu0 %v2231_v49  ;;  %v2327_v48 = vld [vmem:[#allocation7 + $0x2b4] ss:$24 sps:$4 sm:$0xff]   ;;  %v2325_v49 = vld [vmem:[#allocation7 + $0x2b0] ss:$24 sps:$4 sm:$0xff]  }
  0xaa   : > { %1145 = vmatprep.subr.bf16.mxu1 %v2233_v50  ;;  %v2330_v50 = vld [vmem:[#allocation7 + $0x2e4] ss:$24 sps:$4 sm:$0xff]  }
  0xac   : > { %1060 = vmatpush1.bf16.msra.mxu0 %v2235_v51  ;;  %v2328_v51 = vld [vmem:[#allocation7 + $0x2e0] ss:$24 sps:$4 sm:$0xff]  }
  0xad   : > { %1146 = vmatpush1.bf16.msra.mxu1 %v2236_v52  ;;  %1061 = vmatprep.subr.bf16.mxu0 %v2237_v53  ;;  %v2333_v52 = vld [vmem:[#allocation7 + $0x314] ss:$24 sps:$4 sm:$0xff]   ;;  %v2331_v53 = vld [vmem:[#allocation7 + $0x310] ss:$24 sps:$4 sm:$0xff]  }
  0xae   : > { %1147 = vmatprep.subr.bf16.mxu1 %v2239_v54  ;;  %v2336_v54 = vld [vmem:[#allocation7 + $0x344] ss:$24 sps:$4 sm:$0xff]  }
  0xb0   : > { %1062 = vmatpush1.bf16.msra.mxu0 %v2241_v55  ;;  %v2334_v55 = vld [vmem:[#allocation7 + $0x340] ss:$24 sps:$4 sm:$0xff]  }
  0xb1   : > { %1148 = vmatpush1.bf16.msra.mxu1 %v2242_v56  ;;  %1063 = vmatprep.subr.bf16.mxu0 %v2243_v57  ;;  %v2339_v56 = vld [vmem:[#allocation7 + $0x374] ss:$24 sps:$4 sm:$0xff]   ;;  %v2337_v57 = vld [vmem:[#allocation7 + $0x370] ss:$24 sps:$4 sm:$0xff]  }
  0xb2   : > { %1149 = vmatprep.subr.bf16.mxu1 %v2245_v58  ;;  %v2342_v58 = vld [vmem:[#allocation7 + $0x3a4] ss:$24 sps:$4 sm:$0xff]  }
  0xb4   : > { %1064 = vmatpush1.bf16.msra.mxu0 %v2247_v59  ;;  %v2340_v59 = vld [vmem:[#allocation7 + $0x3a0] ss:$24 sps:$4 sm:$0xff]  }
  0xb5   : > { %1150 = vmatpush1.bf16.msra.mxu1 %v2248_v60  ;;  %1065 = vmatprep.subr.bf16.mxu0 %v2249_v61  ;;  %v2343_v60 = vld [vmem:[#allocation9 + $0x40] sm:$0xff]  }
  0xb6   : > { %1151 = vmatprep.subr.bf16.mxu1 %v2251_v62  ;;  %v2344_v61 = vld [vmem:[#allocation9] sm:$0xff]   ;;  %v2345_v62 = vld [vmem:[#allocation9 + $0x48] sm:$0xff]  }
  0xb8   : > { %1066 = vmatpush1.bf16.msra.mxu0 %v2253_v63  ;;  %v2346_v63 = vld [vmem:[#allocation9 + $0x8] sm:$0xff]  }
  0xb9   : > { %1152 = vmatpush1.bf16.msra.mxu1 %v2254_v0  ;;  %1078 = vmatprep.subr.bf16.mxu0 %v2259_v1  ;;  %v2347_v0 = vld [vmem:[#allocation9 + $0x50] sm:$0xff]  }
  0xba   : > { %1164 = vmatprep.subr.bf16.mxu1 %v2262_v2  ;;  %v2348_v1 = vld [vmem:[#allocation9 + $0x10] sm:$0xff]   ;;  %v2349_v2 = vld [vmem:[#allocation9 + $0x58] sm:$0xff]  }
  0xbb   : > { %1068 = vmatmul.mubr.bf16.vlgmr.msra.gmra.mrb[0].mxu0 %v2819_v4 }
  0xbc   : > { %1154 = vmatmul.mubr.bf16.vlgmr.msra.gmra.mrb[0].mxu1 %v2819_v4  ;;  %1079 = vmatpush1.bf16.msra.mxu0 %v2257_v3  ;;  %v2350_v3 = vld [vmem:[#allocation9 + $0x18] sm:$0xff]  }
  0xbd   : > { %1165 = vmatpush1.bf16.msra.mxu1 %v2260_v5  ;;  %1080 = vmatprep.subr.bf16.mxu0 %v2266_v6  ;;  %v2352_v5 = vld [vmem:[#allocation9 + $0x20] sm:$0xff]   ;;  %v2353_v6 = vld [vmem:[#allocation9 + $0x68] sm:$0xff]  }
  0xbe   : > { %1166 = vmatprep.subr.bf16.mxu1 %v2269_v7  ;;  %1110 = vmatprep.mubr.bf16.mxu0 %v2567_v12  ;;  %v2354_v7 = vld [vmem:[#allocation9 + $0x28] sm:$0xff]  }
  0xbf   : > { %1196 = vmatprep.mubr.bf16.mxu1 %v2567_v12 }
  0xc0   : > { %1081 = vmatpush1.bf16.msra.mxu0 %v2264_v8  ;;  %v2355_v8 = vld [vmem:[#allocation9 + $0x70] sm:$0xff]  }
  0xc1   : > { %1167 = vmatpush1.bf16.msra.mxu1 %v2267_v9  ;;  %1082 = vmatprep.subr.bf16.mxu0 %v2272_v10  ;;  %v2356_v9 = vld [vmem:[#allocation9 + $0x30] sm:$0xff]   ;;  %v2357_v10 = vld [vmem:[#allocation9 + $0x78] sm:$0xff]  }
  0xc2   : > { %1168 = vmatprep.subr.bf16.mxu1 %v2275_v11  ;;  %v2358_v11 = vld [vmem:[#allocation9 + $0x38] sm:$0xff]  }
  0xc4   : > { %1083 = vmatpush1.bf16.msra.mxu0 %v2270_v13 }
  0xc5   : > { %1169 = vmatpush1.bf16.msra.mxu1 %v2273_v14  ;;  %1084 = vmatprep.subr.bf16.mxu0 %v2278_v15 }
  0xc6   : > { %1170 = vmatprep.subr.bf16.mxu1 %v2281_v16 }
  0xc8   : > { %1085 = vmatpush1.bf16.msra.mxu0 %v2276_v17 }
  0xc9   : > { %1171 = vmatpush1.bf16.msra.mxu1 %v2279_v18  ;;  %1207 = vmatprep.subr.bf16.mxu0 %v2285_v19 }
  0xca   : > { %2000 = vmatprep.subr.bf16.mxu1 %v2343_v60 }
  0xcb   : > { %1968 = vmatmul.mubr.msk.bf16.vlgmr.msra.gmra.mrb[0].mxu0 %vm1031_vm0, %v2826_v20 }
  0xcc   : > { %1969 = vmatmul.mubr.msk.bf16.vlgmr.msra.gmra.mrb[0].mxu1 %vm1031_vm0, %v2826_v20  ;;  %1208 = vmatpush1.bf16.msra.mxu0 %v2283_v21 }
  0xcd   : > { %1239 = vmatprep.mubr.bf16.mxu0 %v2814_v47  ;;  %1209 = vmatprep.subr.bf16.mxu0 %v2288_v22  ;;  %v2322_v47 = vld [vmem:[#allocation7 + $0x280] ss:$24 sps:$4 sm:$0xff]  }
  0xce   : > { %2001 = vmatpush3.bf16.msra.mxu1 %v2344_v61 }
  0xcf   : > { %2002 = vmatprep.subr.bf16.mxu1 %v2345_v62 }
  0xd0   : > { %1210 = vmatpush1.bf16.msra.mxu0 %v2286_v23 }
  0xd1   : > { %1211 = vmatprep.subr.bf16.mxu0 %v2291_v24 }
  0xd2   : > { %2003 = vmatpush3.bf16.msra.mxu1 %v2346_v63 }
  0xd3   : > { %2004 = vmatprep.subr.bf16.mxu1 %v2347_v0 }
  0xd4   : > { %1212 = vmatpush1.bf16.msra.mxu0 %v2289_v25 }
  0xd5   : > { %1213 = vmatprep.subr.bf16.mxu0 %v2294_v26 }
  0xd6   : > { %2005 = vmatpush3.bf16.msra.mxu1 %v2348_v1 }
  0xd7   : > { %2006 = vmatprep.subr.bf16.mxu1 %v2349_v2 }
  0xd8   : > { %1214 = vmatpush1.bf16.msra.mxu0 %v2292_v27 }
  0xd9   : > { %1215 = vmatprep.subr.bf16.mxu0 %v2297_v28 }
  0xda   : > { %2007 = vmatpush3.bf16.msra.mxu1 %v2350_v3 }
  0xdc   : > { %1216 = vmatpush1.bf16.msra.mxu0 %v2295_v29 }
  0xdd   : > { %1217 = vmatprep.subr.bf16.mxu0 %v2300_v30 }
  0xe0   : > { %1218 = vmatpush1.bf16.msra.mxu0 %v2298_v31 }
  0xe1   : > { %1219 = vmatprep.subr.bf16.mxu0 %v2303_v32 }
  0xe4   : > { %1220 = vmatpush1.bf16.msra.mxu0 %v2301_v33 }
  0xe5   : > { %1221 = vmatprep.subr.bf16.mxu0 %v2306_v34 }
  0xe8   : > { %1222 = vmatpush1.bf16.msra.mxu0 %v2304_v35 }
  0xe9   : > { %1223 = vmatprep.subr.bf16.mxu0 %v2309_v36 }
  0xec   : > { %1224 = vmatpush1.bf16.msra.mxu0 %v2307_v37 }
  0xed   : > { %1225 = vmatprep.subr.bf16.mxu0 %v2312_v38 }
  0xf0   : > { %1226 = vmatpush1.bf16.msra.mxu0 %v2310_v39 }
  0xf1   : > { %1227 = vmatprep.subr.bf16.mxu0 %v2315_v40 }
  0xf4   : > { %1228 = vmatpush1.bf16.msra.mxu0 %v2313_v41 }
  0xf5   : > { %1229 = vmatprep.subr.bf16.mxu0 %v2318_v42 }
  0xf8   : > { %1230 = vmatpush1.bf16.msra.mxu0 %v2316_v43 }
  0xf9   : > { %1231 = vmatprep.subr.bf16.mxu0 %v2321_v44 }
  0xfc   : > { %1232 = vmatpush1.bf16.msra.mxu0 %v2319_v45  ;;  %v2359_v45 = vld [vmem:[#allocation9 + $0x80] sm:$0xff]  }
  0xfd   : > { %1233 = vmatprep.subr.bf16.mxu0 %v2324_v46 }
 0x100   : > { %1234 = vmatpush1.bf16.msra.mxu0 %v2322_v47  ;;  %v2360_v47 = vld [vmem:[#allocation9 + $0x88] sm:$0xff]  }
 0x101   : > { %1235 = vmatprep.subr.bf16.mxu0 %v2327_v48  ;;  %v2361_v48 = vld [vmem:[#allocation9 + $0x90] sm:$0xff]  }
 0x104   : > { %1236 = vmatpush1.bf16.msra.mxu0 %v2325_v49  ;;  %v2362_v49 = vld [vmem:[#allocation9 + $0x98] sm:$0xff]  }
 0x105   : > { %1237 = vmatprep.subr.bf16.mxu0 %v2330_v50  ;;  %v2363_v50 = vld [vmem:[#allocation9 + $0xa0] sm:$0xff]  }
 0x108   : > { %1238 = vmatpush1.bf16.msra.mxu0 %v2328_v51  ;;  %v2364_v51 = vld [vmem:[#allocation9 + $0xa8] sm:$0xff]  }
 0x109   : > { %1250 = vmatprep.subr.bf16.mxu0 %v2333_v52  ;;  %v2365_v52 = vld [vmem:[#allocation9 + $0xb0] sm:$0xff]  }
 0x10b   : > { %1240 = vmatmul.mubr.bf16.vlgmr.msra.gmra.mrb[4].mxu0 %v2819_v4  ;;  %v2351_v4 = vld [vmem:[#allocation9 + $0x60] sm:$0xff]  }
 0x10c   : > { %1251 = vmatpush1.bf16.msra.mxu0 %v2331_v53  ;;  %1282 = vmatprep.mubr.bf16.mxu0 %v2567_v12  ;;  %v2568_v12 = vmov 0.0   ;;  %v2366_v53 = vld [vmem:[#allocation9 + $0xb8] sm:$0xff]  }
 0x10d   : > { %1252 = vmatprep.subr.bf16.mxu0 %v2336_v54  ;;  %2008 = vmatprep.subr.bf16.mxu1 %v2351_v4  ;;  %v1635_v4 = vlaneseq }
 0x10e   : > { %2009 = vmatpush3.bf16.msra.mxu1 %v2352_v5 }
 0x10f   : > { %2010 = vmatprep.subr.bf16.mxu1 %v2353_v6  ;;  %v1636_v5 = vshrl.u32 %v1635_v4, 7  ;;  %v1641_v6 = vstv %s1633_s10 }
 0x110   : > { %1253 = vmatpush1.bf16.msra.mxu0 %v2334_v55 }
 0x111   : > { %1254 = vmatprep.subr.bf16.mxu0 %v2339_v56  ;;  %vm1642_vm2 = vcmp.lt.s32.totalorder %v1636_v5, %v1641_v6 }
 0x112   : > { %2011 = vmatpush3.bf16.msra.mxu1 %v2354_v7  ;;  %v1637_v7 = vadd.s32 8, %v1636_v5 }
 0x113   : > { %2012 = vmatprep.subr.bf16.mxu1 %v2355_v8 }
 0x114   : > { %1255 = vmatpush1.bf16.msra.mxu0 %v2337_v57  ;;  %vm1643_vm3 = vcmp.lt.s32.totalorder %v1637_v7, %v1641_v6 }
 0x115   : > { %1256 = vmatprep.subr.bf16.mxu0 %v2342_v58 }
 0x116   : > { %2013 = vmatpush3.bf16.msra.mxu1 %v2356_v9 }
 0x117   : > { %2014 = vmatprep.subr.bf16.mxu1 %v2357_v10 }
 0x118   : > { %1257 = vmatpush1.bf16.msra.mxu0 %v2340_v59 }
 0x11a   : > { %2015 = vmatpush3.bf16.msra.mxu1 %v2358_v11 }
 0x11b   : > { %1970 = vmatmul.mubr.msk.bf16.vlgmr.msra.gmra.mrb[4].mxu0 %vm1031_vm0, %v2826_v20  ;;  %2031 = vmatprep.subr.bf16.mxu1 %v2568_v12 }
 0x19e   : > { %v1112_v13 = vpop.f32.mrb[0].mxu0 }
 0x19f   : > { %v1198_v14 = vpop.f32.mrb[0].mxu1  ;;  %v1293_v15 = vmul.f32 %v1112_v13, %v1112_v13  ;;  %v1114_v16 = vpop.f32.mrb[1].mxu0 }
 0x1a0   : > { %v1200_v17 = vpop.f32.mrb[1].mxu1  ;;  %v1116_v19 = vpop.f32.mrb[2].mxu0  ;;  %v1294_v29 = vmul.f32 %v1114_v16, %v1114_v16  ;;  %v1295_v32 = vmul.f32 %v1198_v14, %v1198_v14 }
 0x1a1   : > { %v1299_v18 = vmul.f32 %v1200_v17, %v1200_v17  ;;  %v1202_v20 = vpop.f32.mrb[2].mxu1  ;;  %v1296_v21 = vmul.f32 %v1116_v19, %v1116_v19  ;;  %v1118_v22 = vpop.f32.mrb[3].mxu0 }
 0x1a2   : > { %v1204_v23 = vpop.f32.mrb[3].mxu1  ;;  %v1297_v35 = vmul.f32 %v1118_v22, %v1118_v22  ;;  %v1298_v39 = vmul.f32 %v1202_v20, %v1202_v20 }
 0x1a3   : > { %v1305_v24 = vadd.f32 %v1299_v18, %v1293_v15  ;;  %v1302_v25 = vmul.f32 %v1204_v23, %v1204_v23 }
 0x1a5   : > { %v1308_v26 = vadd.f32 %v1302_v25, %v1296_v21 }
 0x1a7   : > { %v1311_v27 = vpack.c.bf16 %v1308_v26, %v1305_v24 }
 0x1ee   : > { %v1284_v28 = vpop.f32.mrb[4].mxu0 }
 0x1ef   : > { %v1300_v30 = vmul.f32 %v1284_v28, %v1284_v28  ;;  %v1286_v31 = vpop.f32.mrb[5].mxu0 }
 0x1f0   : > { %v1301_v33 = vmul.f32 %v1286_v31, %v1286_v31  ;;  %v1288_v34 = vpop.f32.mrb[6].mxu0 }
 0x1f1   : > { %v1306_v36 = vadd.f32 %v1300_v30, %v1294_v29  ;;  %v1303_v37 = vmul.f32 %v1288_v34, %v1288_v34  ;;  %v1290_v38 = vpop.f32.mrb[7].mxu0 }
 0x1f2   : > { %v1307_v40 = vadd.f32 %v1301_v33, %v1295_v32  ;;  %v1304_v41 = vmul.f32 %v1290_v38, %v1290_v38 }
 0x1f3   : > { %v1309_v42 = vadd.f32 %v1303_v37, %v1297_v35 }
 0x1f4   : > { %v1310_v43 = vadd.f32 %v1304_v41, %v1298_v39 }
 0x1f5   : > { %v1312_v44 = vpack.c.bf16 %v1309_v42, %v1306_v36 }
 0x1f6   : > { %v1313_v46 = vpack.c.bf16 %v1310_v43, %v1307_v40 }
 0x1f7   : > { %1538 = vmatprep.mubr.bf16.mxu1 %v1312_v44 }
 0x1f8   : > { %1539 = vmatmul.mubr.bf16.vlgmr.msra.gmra.mrb[4].mxu1 %v1311_v27 }
 0x1f9   : > { %2032 = vmatpush3.bf16.msra.mxu1 %v2359_v45  ;;  %2047 = vmatprep.mubr.msk.bf16.mxu1 %vm2569_vm1, %v2568_v12 }
 0x1fa   : > { %2033 = vmatprep.subr.bf16.mxu1 %v2568_v12 }
 0x1fd   : > { %2034 = vmatpush3.bf16.msra.mxu1 %v2360_v47 }
 0x1fe   : > { %2035 = vmatprep.subr.bf16.mxu1 %v2568_v12 }
 0x201   : > { %2036 = vmatpush3.bf16.msra.mxu1 %v2361_v48 }
 0x202   : > { %2037 = vmatprep.subr.bf16.mxu1 %v2568_v12 }
 0x205   : > { %2038 = vmatpush3.bf16.msra.mxu1 %v2362_v49 }
 0x206   : > { %2039 = vmatprep.subr.bf16.mxu1 %v2568_v12 }
 0x209   : > { %2040 = vmatpush3.bf16.msra.mxu1 %v2363_v50 }
 0x20a   : > { %2041 = vmatprep.subr.bf16.mxu1 %v2568_v12 }
 0x20d   : > { %2042 = vmatpush3.bf16.msra.mxu1 %v2364_v51 }
 0x20e   : > { %2043 = vmatprep.subr.bf16.mxu1 %v2568_v12 }
 0x211   : > { %2044 = vmatpush3.bf16.msra.mxu1 %v2365_v52 }
 0x212   : > { %2045 = vmatprep.subr.bf16.mxu1 %v2568_v12 }
 0x215   : > { %2046 = vmatpush3.bf16.msra.mxu1 %v2366_v53 }
 0x218   : > { %2048 = vmatmul.mubr.bf16.vlgmr.msra.gmra.mrb[8].mxu1 %v1313_v46 }
 0x2cb   : > { %v2016_v54 = vpop.f32.mrb[4].mxu1 }
 0x2cc   : > { %v2017_v55 = vpop.f32.mrb[5].mxu1 }
 0x2cd   : > { %v2018_v56 = vadd.f32 %v2017_v55, %v2016_v54  ;;  %v2019_v57 = vpop.f32.mrb[6].mxu1 }
 0x2ce   : > { %v2020_v58 = vpop.f32.mrb[7].mxu1 }
 0x2cf   : > { %v2021_v59 = vadd.f32 %v2020_v58, %v2019_v57  ;;  %v1541_v60 = vadd.f32 5.9604645e-08, %v2018_v56 }
 0x2d1   : > { %v1544_v62 = vadd.f32 5.9604645e-08, %v2021_v59 }
 0x2eb   : > { %v1581_v61 = vpop.f32.mrb[8].mxu1 }
 0x2ec   : > { %v1582_v63 = vadd.f32 %v1581_v61, %v1541_v60  ;;  %v2049_v0 = vpop.f32.mrb[9].mxu1 }
 0x2ed   : > { %v1584_v1 = vpop.f32.mrb[10].mxu1 }
 0x2ee   : > { %2367 = vlog2.f32 %v1582_v63  ;;  %v1585_v2 = vadd.f32 %v1584_v1, %v1544_v62  ;;  %v2050_v3 = vpop.f32.mrb[11].mxu1 }
 0x2f0   : > { %2369 = vlog2.f32 %v1585_v2 }
 0x2f8   : > { %v2368_v8 = vpop.eup %2367 }
 0x2f9   : > { %v1589_v9 = vmul.f32 0.6931472, %v2368_v8 }
 0x2fa   : > { %v2370_v10 = vpop.eup %2369 }
 0x2fb   : > { %1592 = vxpose.xlu0.b32.start [1/2] (short) (narrow) %v1589_v9, 64  ;;  %v1648_v11 = vsel %vm1642_vm2, %v1589_v9, 0.0  ;;  %v1591_v12 = vmul.f32 0.6931472, %v2370_v10 }
 0x2fc   : > { %v1657_v14 = vmul.f32 %v1648_v11, %v1648_v11 }
 0x2fd   : > { %v1649_v13 = vsel %vm1643_vm3, %v1591_v12, 0.0 }
 0x2fe   : > { %v1650_v15 = vadd.f32 %v1649_v13, %v1648_v11  ;;  %v1658_v16 = vmul.f32 %v1649_v13, %v1649_v13 }
 0x2ff   : > { %1593 = vxpose.xlu0.b32.end [2/2] (short) (narrow) %v1591_v12, 64 }
 0x300   : > { %v1651_v17 = vrot.slane %v1650_v15, 4  ;;  %v1659_v18 = vadd.f32 %v1658_v16, %v1657_v14 }
 0x302   : > { %v1652_v19 = vadd.f32 %v1651_v17, %v1650_v15  ;;  %v1660_v20 = vrot.slane %v1659_v18, 4 }
 0x304   : > { %v1653_v21 = vrot.slane %v1652_v19, 2  ;;  %v1661_v22 = vadd.f32 %v1660_v20, %v1659_v18 }
 0x306   : > { %v1654_v23 = vadd.f32 %v1653_v21, %v1652_v19  ;;  %v1662_v24 = vrot.slane %v1661_v22, 2 }
 0x308   : > { %v1655_v25 = vrot.slane %v1654_v23, 1  ;;  %v1663_v26 = vadd.f32 %v1662_v24, %v1661_v22 }
 0x30a   : > { %v1664_v27 = vrot.slane %v1663_v26, 1  ;;  %v1656_v28 = vadd.f32 %v1655_v25, %v1654_v23 }
 0x30c   : > { %v1665_v29 = vadd.f32 %v1664_v27, %v1663_v26 }
 0x30e   : > { %v1667_v30 = vsel %vm1666_vm4, %v1656_v28, %v1665_v29 }
 0x30f   : > { %1668 = vst [vmem:[%s281_s14] sm:$0x3] %v1667_v30 }
 0x310   : > { %2480 = shalt.err (!%p2477_p5)
}
 0x311   : > { %s2481_s19 = scalar_lea.hbm %s2843_s11, 32  ;;  %s2485_s10 = scalar_lea.hbm %s2904_s5, 64 }
 0x312   : > { %p2482_p3 = scmp.ne.s32.totalorder %s2843_s11, %s2481_s19  ;;  %p2486_p9 = scmp.lt.u32.totalorder %s2843_s11, %s2904_s5 }
 0x313   : > { %p2487_p10 = scmp.lt.u32.totalorder %s2485_s10, %s2481_s19  ;;  %p2489_p11 = scmp.lt.u32.totalorder %s2481_s19, %s2843_s11 }
 0x314   : > { %p2483_p7 = pnand %p2482_p3, %p2919_p1 }
 0x315   : > { %p2488_p0 = por %p2487_p10, %p2486_p9 }
 0x316   : > { %p2484_p2 = pneg %p2483_p7 }
 0x317   : > { %p2490_p4 = por %p2489_p11, %p2488_p0 }
 0x319   : > { %p2491_p13 = pnand %p2490_p4, %p2484_p2 }
 0x31b   : > { %2494 = shalt.err (!%p2491_p13)
}
 0x31c   : > { %2076 = dma.vmem_to_hbm [thread:$0]  (%p2919_p1), %s1696_s16, 32, %s2843_s11, %s1678_s27   ;;  %vm1624_vm5 = vcmask 130048  }
 0x31d   : > { %p283_p6 = scmp.lt.s32.totalorder %s2547_s6, 1 }
 0x31f   : > { %s2930_s6 = smov (!%p283_p6, %s2547_s6), 1 }
 0x320   : > { %s1999_s23 = sshll.u32 %s2930_s6, 6 }
 0x321   : > { %s290_s20 = scalar_lea.vmem %s2903_s4, %s1999_s23 }
 0x37b   : > { %v1608_v31 = vpop.trf.xlu0 }
 0x37c   : > { %1625 = vst.msk [vmem:[%s290_s20] sm:$0xff] %vm1624_vm5, %v1608_v31 }
 0x37f   : > { %v1609_v32 = vpop.trf.xlu0 }
 0x380   : > { %1626 = vst.msk [vmem:[%s290_s20 + $0x8] sm:$0xff] %vm1624_vm5, %v1609_v32 }
 0x383   : > { %v1610_v33 = vpop.trf.xlu0 }
 0x384   : > { %1627 = vst.msk [vmem:[%s290_s20 + $0x10] sm:$0xff] %vm1624_vm5, %v1610_v33 }
 0x387   : > { %v1611_v34 = vpop.trf.xlu0 }
 0x388   : > { %1628 = vst.msk [vmem:[%s290_s20 + $0x18] sm:$0xff] %vm1624_vm5, %v1611_v34 }
 0x38b   : > { %v1612_v35 = vpop.trf.xlu0 }
 0x38c   : > { %1629 = vst.msk [vmem:[%s290_s20 + $0x20] sm:$0xff] %vm1624_vm5, %v1612_v35 }
 0x38f   : > { %v1613_v36 = vpop.trf.xlu0 }
 0x390   : > { %1630 = vst.msk [vmem:[%s290_s20 + $0x28] sm:$0xff] %vm1624_vm5, %v1613_v36 }
 0x393   : > { %v1614_v37 = vpop.trf.xlu0 }
 0x394   : > { %1631 = vst.msk [vmem:[%s290_s20 + $0x30] sm:$0xff] %vm1624_vm5, %v1614_v37 }
 0x397   : > { %v1615_v38 = vpop.trf.xlu0 }
 0x398   : > { %1632 = vst.msk [vmem:[%s290_s20 + $0x38] sm:$0xff] %vm1624_vm5, %v1615_v38 }
 0x399 PF: > { %s1718_s6 = sand.u32 1, %s2535_s28   ;;  %p2920_p1 = scmp.ne.s32.totalorder %s2912_s13, 0 }
 0x39a   : > { %p2921_p8 = scmp.ge.s32.totalorder %s2555_s8, 2  ;;  %s1719_s21 = scalar_lea.sflag [#allocation6], %s1718_s6 }
 0x39c   : > { %p2090_p12 = pnand %p2921_p8, %p2920_p1 }
 0x39e   : > { %2530 = dma.done.wait (!%p2090_p12), %s1719_s21, 32  }
 0x39f   : > { %2532 = vsyncadd (!%p2090_p12), %s1719_s21, 4294967264  ;;  %s27_s8 = sadd.s32 1, %s2555_s8   ;;  %s2922_s28 = smov %s2539_s29 }
 0x3a0   : > { %p24_p5 = scmp.ge.s32.totalorder %s27_s8, 4   ;;  %s2923_s29 = smov %s2543_s30 }
 0x3a1   : > { %s2924_s30 = smov %s2758_s24  ;;  %s2925_s6 = smov %s2551_s7 }
 0x3a2   : > { %s2926_s7 = smov %s2928_s18  ;;  %26 = sbr.rel (!%p24_p5) target bundleno = 19 (0x13), region = 97 }
 0x3a9   :  { %1724 = vsyncpa [#allocation5], 1 }
 0x3aa   :  { %1726 = vsyncpa [#allocation5 + $0x1], 1 }
 0x3ab   :  { %1727 = vsyncpa [#allocation8], 1 }
 0x3ac   :  { %1728 = vsyncpa [#allocation6], 1 }
 0x3ad   :  { %1730 = vsyncpa [#allocation6 + $0x1], 1 }

</bundles_post_ra>
